<compile_context>
chip_gen: v7x
topology: tpu7x:2x2x1
jax: 0.10.0
libtpu: 0.0.40
codegen_flags: <defaults>
</compile_context>

<pallas_src>
import functools

import jax
import jax.numpy as jnp
from jax.experimental import pallas as pl
from jax.experimental.pallas import tpu as pltpu


# ----------------------------------------------------------------------------
# Hardware-aware heuristics
# ----------------------------------------------------------------------------
def _device_kind() -> str:
    try:
        return jax.devices()[0].device_kind.lower()
    except Exception:
        return ""


def _batch_tile_cap() -> int:
    """Largest batch (lane) tile per grid step, per TPU generation."""
    kind = _device_kind()
    if ("v3" in kind) or ("v4" in kind) or ("v5" in kind):
        return 8192            # v5e: 16 MiB scoped default, be conservative
    if "v7" in kind:
        return 16384           # v7x: 64 MiB physical VMEM per TC
    return 32768               # v6e: 128 MiB physical VMEM


def _bf16_activations_ok() -> bool:
    """bf16 VPU/EUP (tanh) exists on v6e / v7x only."""
    kind = _device_kind()
    return ("v6" in kind) or ("v7" in kind)


def _vmem_limit_bytes() -> int:
    kind = _device_kind()
    if "v7" in kind:
        return 48 * 1024 * 1024    # headroom under 64 MiB physical
    return 64 * 1024 * 1024


def _round_up(x: int, m: int) -> int:
    return ((x + m - 1) // m) * m


def _choose_batch_tile(B: int, cap: int):
    """Return (tb, B_pad): biggest lane tile under the VMEM cap, >= 2 grid
    steps when the batch is big enough (feeds both v7x TensorCores), padding
    B up to a multiple of tb."""
    if B <= 256:
        return B, B                     # single full-array block (any size legal)
    n_steps = max(2, pl.cdiv(B, cap))
    tb = min(cap, _round_up(pl.cdiv(B, n_steps), 128))
    return tb, _round_up(B, tb)


# ----------------------------------------------------------------------------
# Kernel
# ----------------------------------------------------------------------------
def _make_mhn_kernel(n_body_layers: int, vpu_first_layer: bool, d_in: int,
                     act_dtype):
    """Kernel for `n_body_layers` body Linear+tanh layers + fused heads.

    Activations stay transposed: (features, batch_tile) -> the batch dimension
    is the 128-lane axis everywhere (lane-dense loads and stores).
    """

    def kernel(*refs):
        # refs = [x_t, (w_i, b_i) * n_body, wh, bh, wo_t, out_t]
        x_ref = refs[0]
        body_refs = refs[1:1 + 2 * n_body_layers]
        wh_ref, bh_ref, wo_ref, out_ref = refs[1 + 2 * n_body_layers:]

        x = x_ref[...]                                  # (d_in, tb)

        # ---- first body layer ----
        w0 = body_refs[0][...]                          # (h1, d_in)
        b0 = body_refs[1][...]                          # (h1, 1) f32
        if vpu_first_layer:
            # K == d_in is tiny: VPU broadcast-FMAs in f32, skip the MXU.
            x32 = x.astype(jnp.float32)
            acc = b0 + w0[:, 0:1] * x32[0:1, :]
            for k in range(1, d_in):
                acc = acc + w0[:, k:k + 1] * x32[k:k + 1, :]
        else:
            acc = jnp.dot(w0, x.astype(w0.dtype),
                          preferred_element_type=jnp.float32) + b0
        z = jnp.tanh(acc.astype(act_dtype))             # (h1, tb)

        # ---- remaining body layers (MXU, f32 acc) ----
        for i in range(1, n_body_layers):
            w = body_refs[2 * i][...]                   # (out, in)
            b = body_refs[2 * i + 1][...]               # (out, 1) f32
            acc = jnp.dot(w, z.astype(w.dtype),
                          preferred_element_type=jnp.float32) + b
            z = jnp.tanh(acc.astype(act_dtype))

        # ---- all head hidden layers fused into one matmul + tanh ----
        acc = jnp.dot(wh_ref[...], z.astype(wh_ref.dtype),
                      preferred_element_type=jnp.float32) + bh_ref[...]
        h = jnp.tanh(acc.astype(act_dtype))

        # ---- all head output projections fused via block-diagonal weight ----
        out = jnp.dot(wo_ref[...], h.astype(wo_ref.dtype),
                      preferred_element_type=jnp.float32)   # (n_out, tb)
        out_ref[...] = out.astype(out_ref.dtype)

    return kernel


# ----------------------------------------------------------------------------
# Primary API: transposed (features, batch) layout end-to-end
# ----------------------------------------------------------------------------
def mhn_forward_t(x_t, body_params, wh, bh, wo_t, *,
                  batch_tile=None, use_bf16=True, bf16_act=None,
                  out_dtype=jnp.float32):
    """Fused MHN forward in transposed layout (no wrapper-side transposes).

    Args:
      x_t:         (d_in, B) input, features-major.
      body_params: list of (W_i (out, in), b_i (out, 1)) for each body layer.
      wh:          (n_out*n_hid, h_body) stacked head-hidden weights.
      bh:          (n_out*n_hid, 1) stacked head-hidden biases.
      wo_t:        (n_out, n_out*n_hid) block-diagonal head output weights.
    Returns:
      (n_out, B) array of `out_dtype`.
    """
    d_in, B = x_t.shape
    n_out = wo_t.shape[0]
    n_body = len(body_params)
    vpu_first = d_in <= 8

    mat_dtype = jnp.bfloat16 if use_bf16 else jnp.float32
    if bf16_act is None:
        bf16_act = use_bf16 and _bf16_activations_ok()
    act_dtype = jnp.bfloat16 if (use_bf16 and bf16_act) else jnp.float32

    # ---- batch (lane) tiling ----
    cap = _batch_tile_cap()
    if batch_tile is not None:
        tb = max(128, (min(int(batch_tile), cap) // 128) * 128)
        B_pad = _round_up(B, tb)
    else:
        tb, B_pad = _choose_batch_tile(B, cap)

    # x is streamed in the matmul dtype (bf16 halves its HBM bytes); the tiny
    # K=d_in VPU first layer upcasts to f32 inside the kernel.
    x_c = x_t.astype(mat_dtype)
    if B_pad != B:
        x_c = jnp.pad(x_c, ((0, 0), (0, B_pad - B)))

    def _full(a):
        return pl.BlockSpec(a.shape, lambda i: (0, 0))

    flat = []
    in_specs = [pl.BlockSpec((d_in, tb), lambda i: (0, i))]
    for li, (w, b) in enumerate(body_params):
        w_dt = jnp.float32 if (li == 0 and vpu_first) else mat_dtype
        w_c = w.astype(w_dt)
        b_c = b.astype(jnp.float32)
        flat += [w_c, b_c]
        in_specs += [_full(w_c), _full(b_c)]
    wh_c = wh.astype(mat_dtype)
    bh_c = bh.astype(jnp.float32)
    wo_c = wo_t.astype(mat_dtype)
    flat += [wh_c, bh_c, wo_c]
    in_specs += [_full(wh_c), _full(bh_c), _full(wo_c)]

    out_specs = pl.BlockSpec((n_out, tb), lambda i: (0, i))

    # ---- advisory cost estimate ----
    flops = 0
    for (w, _) in body_params:
        flops += 2 * B_pad * w.shape[0] * w.shape[1]
    flops += 2 * B_pad * (wh.shape[0] * wh.shape[1]
                          + wo_t.shape[0] * wo_t.shape[1])
    transcendentals = B_pad * (sum(w.shape[0] for (w, _) in body_params)
                               + wh.shape[0])
    bytes_accessed = int(x_c.size * x_c.dtype.itemsize
                         + n_out * B_pad * jnp.dtype(out_dtype).itemsize
                         + sum(a.size * a.dtype.itemsize for a in flat))
    cost = pl.CostEstimate(flops=int(flops),
                           transcendentals=int(transcendentals),
                           bytes_accessed=bytes_accessed)

    kernel = _make_mhn_kernel(n_body, vpu_first, d_in, act_dtype)

    fn = pl.pallas_call(
        kernel,
        out_shape=jax.ShapeDtypeStruct((n_out, B_pad), out_dtype),
        grid_spec=pltpu.PrefetchScalarGridSpec(
            num_scalar_prefetch=0,
            grid=(B_pad // tb,),
            in_specs=in_specs,
            out_specs=out_specs,
        ),
        compiler_params=pltpu.CompilerParams(
            dimension_semantics=("parallel",),
            vmem_limit_bytes=_vmem_limit_bytes()),
        cost_estimate=cost,
    )
    out_t = fn(x_c, *flat)                   # (n_out, B_pad), lane-dense stores
    if B_pad != B:
        out_t = out_t[:, :B]
    return out_t


# ----------------------------------------------------------------------------
# Convenience wrapper: natural PyTorch-style layout (call under jit so the
# transposes fuse with neighbouring ops; prefer mhn_forward_t for raw speed).
# ----------------------------------------------------------------------------
def mhn_forward(x, body_params, wh, bh, wo_t, **kwargs):
    out_t = mhn_forward_t(jnp.transpose(x), body_params, wh, bh, wo_t, **kwargs)
    return jnp.transpose(out_t)              # (B, n_out)


# ----------------------------------------------------------------------------
# Deterministic parameter construction (xavier_normal weights, zero biases).
# Weights stored in PyTorch nn.Linear layout: (out, in).
# ----------------------------------------------------------------------------
def _xavier_normal(key, fan_out, fan_in):
    std = (2.0 / (fan_in + fan_out)) ** 0.5
    return std * jax.random.normal(key, (fan_out, fan_in), dtype=jnp.float32)


def build_mhn_params(nn_layers, key):
    assert len(nn_layers) >= 4
    n_out = nn_layers[-1]
    n_hid = nn_layers[-2] // n_out
    h_body = nn_layers[-3]
    n_body = len(nn_layers) - 3

    keys = jax.random.split(key, n_body + 2 * n_out)
    ki = 0

    body_params = []
    for i in range(n_body):
        w = _xavier_normal(keys[ki], nn_layers[i + 1], nn_layers[i]); ki += 1
        b = jnp.zeros((nn_layers[i + 1], 1), dtype=jnp.float32)
        body_params.append((w, b))

    wh_blocks, wo_blocks = [], []
    for _ in range(n_out):
        wh_blocks.append(_xavier_normal(keys[ki], n_hid, h_body)); ki += 1
        wo_blocks.append(_xavier_normal(keys[ki], 1, n_hid)); ki += 1

    wh = jnp.concatenate(wh_blocks, axis=0)            # (n_out*n_hid, h_body)
    bh = jnp.zeros((n_out * n_hid, 1), dtype=jnp.float32)

    # Block-diagonal output projection, transposed: out[b, k] = h_k @ wo_k
    wo_t = jnp.zeros((n_out, n_out * n_hid), dtype=jnp.float32)
    for k in range(n_out):
        wo_t = wo_t.at[k, k * n_hid:(k + 1) * n_hid].set(wo_blocks[k][0])

    return body_params, wh, bh, wo_t


# ----------------------------------------------------------------------------
# Pure-JAX reference (mirrors the kernel's mixed-precision policy when asked).
# ----------------------------------------------------------------------------
def mhn_forward_ref(x, body_params, wh, bh, wo_t, *,
                    mat_dtype=jnp.float32, act_dtype=jnp.float32,
                    vpu_first=True):
    z = x
    for li, (w, b) in enumerate(body_params):
        if li == 0 and vpu_first:
            acc = z.astype(jnp.float32) @ w.T.astype(jnp.float32) + b[:, 0]
        else:
            acc = jnp.dot(z.astype(mat_dtype), w.T.astype(mat_dtype),
                          preferred_element_type=jnp.float32) + b[:, 0]
        z = jnp.tanh(acc.astype(act_dtype))
    acc = jnp.dot(z.astype(mat_dtype), wh.T.astype(mat_dtype),
                  preferred_element_type=jnp.float32) + bh[:, 0]
    h = jnp.tanh(acc.astype(act_dtype))
    return jnp.dot(h.astype(mat_dtype), wo_t.T.astype(mat_dtype),
                   preferred_element_type=jnp.float32)


if __name__ == "__main__":
    # MHN: nn_layers = [2, 32, 32, 4]
    #   body:  Linear(2,32)+tanh
    #   heads: 4 heads, each Linear(32, 8)+tanh -> Linear(8, 1, bias=False)
    nn_layers = [2, 32, 32, 4]
    d_in, n_out = nn_layers[0], nn_layers[-1]

    key = jax.random.PRNGKey(0)
    kx, kp = jax.random.split(key)

    batch = 1024
    x = jax.random.normal(kx, (batch, d_in), dtype=jnp.float32)
    body_params, wh, bh, wo_t = build_mhn_params(nn_layers, kp)

    # ---- f32 path, natural layout, whole path under one jit ----
    fwd_f32 = jax.jit(functools.partial(mhn_forward, use_bf16=False))
    out_f32 = jax.block_until_ready(fwd_f32(x, body_params, wh, bh, wo_t))
    ref_f32 = mhn_forward_ref(x, body_params, wh, bh, wo_t,
                              vpu_first=(d_in <= 8))
    assert out_f32.shape == (batch, n_out)
    assert jnp.allclose(out_f32, ref_f32, atol=1e-4, rtol=1e-4), \
        "f32 mismatch vs reference"

    # ---- bf16 matmul path (default), lane-dense transposed API ----
    act_dt = jnp.bfloat16 if _bf16_activations_ok() else jnp.float32
    out_bf16_t = jax.block_until_ready(
        mhn_forward_t(x.T.astype(jnp.bfloat16), body_params, wh, bh, wo_t,
                      use_bf16=True))
    ref_bf16 = mhn_forward_ref(x.astype(jnp.bfloat16), body_params, wh, bh,
                               wo_t, mat_dtype=jnp.bfloat16, act_dtype=act_dt,
                               vpu_first=(d_in <= 8))
    assert out_bf16_t.shape == (n_out, batch)
    assert jnp.allclose(out_bf16_t.T, ref_bf16, atol=3e-2, rtol=3e-2), \
        "bf16 mismatch vs reference"

    # ---- ragged batch: exercise the pad-to-tile fallback path ----
    xr = jax.random.normal(kx, (300, d_in), dtype=jnp.float32)
    out_r = jax.block_until_ready(
        mhn_forward(xr, body_params, wh, bh, wo_t, use_bf16=False))
    ref_r = mhn_forward_ref(xr, body_params, wh, bh, wo_t,
                            vpu_first=(d_in <= 8))
    assert out_r.shape == (300, n_out)
    assert jnp.allclose(out_r, ref_r, atol=1e-4, rtol=1e-4), \
        "padded-batch mismatch vs reference"

    print("KERNEL_OK")
</pallas_src>

<mosaic_0001>
module attributes {stable_mosaic.version = 11 : i64} {
  func.func @kernel(%arg0: i32, %arg1: memref<2x512xf32, #tpu.memory_space<vmem>>, %arg2: memref<32x2xf32, #tpu.memory_space<vmem>>, %arg3: memref<32x1xf32, #tpu.memory_space<vmem>>, %arg4: memref<32x32xf32, #tpu.memory_space<vmem>>, %arg5: memref<32x1xf32, #tpu.memory_space<vmem>>, %arg6: memref<4x32xf32, #tpu.memory_space<vmem>>, %arg7: memref<4x512xf32, #tpu.memory_space<vmem>>) attributes {dimension_semantics = [#tpu.dimension_semantics<parallel>], iteration_bounds = array<i64: 2>, scalar_prefetch = 0 : i64, scratch_operands = 0 : i64, tpu.core_type = #tpu.core_type<tc>, window_params = [{transform_indices = @transform_0, window_bounds = array<i64: 2, 512>}, {pipeline_mode = #tpu.pipeline_mode<synchronous>, transform_indices = @transform_1, window_bounds = array<i64: 32, 2>}, {pipeline_mode = #tpu.pipeline_mode<synchronous>, transform_indices = @transform_2, window_bounds = array<i64: 32, 1>}, {pipeline_mode = #tpu.pipeline_mode<synchronous>, transform_indices = @transform_3, window_bounds = array<i64: 32, 32>}, {pipeline_mode = #tpu.pipeline_mode<synchronous>, transform_indices = @transform_4, window_bounds = array<i64: 32, 1>}, {pipeline_mode = #tpu.pipeline_mode<synchronous>, transform_indices = @transform_5, window_bounds = array<i64: 4, 32>}, {transform_indices = @transform_6, window_bounds = array<i64: 4, 512>}]} {
    %c0 = arith.constant 0 : index
    %c0_0 = arith.constant 0 : index
    %0 = vector.load %arg1[%c0, %c0_0] : memref<2x512xf32, #tpu.memory_space<vmem>>, vector<2x512xf32>
    %c0_1 = arith.constant 0 : index
    %c0_2 = arith.constant 0 : index
    %1 = vector.load %arg2[%c0_1, %c0_2] : memref<32x2xf32, #tpu.memory_space<vmem>>, vector<32x2xf32>
    %c0_3 = arith.constant 0 : index
    %c0_4 = arith.constant 0 : index
    %2 = vector.load %arg3[%c0_3, %c0_4] : memref<32x1xf32, #tpu.memory_space<vmem>>, vector<32x1xf32>
    %3 = vector.extract_strided_slice %1 {offsets = [0, 0], sizes = [32, 1], strides = [1, 1]} : vector<32x2xf32> to vector<32x1xf32>
    %4 = vector.extract_strided_slice %0 {offsets = [0, 0], sizes = [1, 512], strides = [1, 1]} : vector<2x512xf32> to vector<1x512xf32>
    %5 = vector.broadcast %3 : vector<32x1xf32> to vector<32x512xf32>
    %6 = vector.broadcast %4 : vector<1x512xf32> to vector<32x512xf32>
    %7 = arith.mulf %5, %6 : vector<32x512xf32>
    %8 = vector.broadcast %2 : vector<32x1xf32> to vector<32x512xf32>
    %9 = arith.addf %8, %7 : vector<32x512xf32>
    %10 = vector.extract_strided_slice %1 {offsets = [0, 1], sizes = [32, 1], strides = [1, 1]} : vector<32x2xf32> to vector<32x1xf32>
    %11 = vector.extract_strided_slice %0 {offsets = [1, 0], sizes = [1, 512], strides = [1, 1]} : vector<2x512xf32> to vector<1x512xf32>
    %12 = vector.broadcast %10 : vector<32x1xf32> to vector<32x512xf32>
    %13 = vector.broadcast %11 : vector<1x512xf32> to vector<32x512xf32>
    %14 = arith.mulf %12, %13 : vector<32x512xf32>
    %15 = arith.addf %9, %14 : vector<32x512xf32>
    %16 = math.tanh %15 : vector<32x512xf32>
    %c0_5 = arith.constant 0 : index
    %c0_6 = arith.constant 0 : index
    %17 = vector.load %arg4[%c0_5, %c0_6] : memref<32x32xf32, #tpu.memory_space<vmem>>, vector<32x32xf32>
    %cst = arith.constant dense<0.000000e+00> : vector<32x512xf32>
    %18 = tpu.matmul %17, %16, %cst {dimension_numbers = #tpu.dot_dimension_numbers<[1], [0], [0], [1], [0, 0, 1, 1], [], []>} : vector<32x32xf32>, vector<32x512xf32>, vector<32x512xf32> -> vector<32x512xf32>
    %c0_7 = arith.constant 0 : index
    %c0_8 = arith.constant 0 : index
    %19 = vector.load %arg5[%c0_7, %c0_8] : memref<32x1xf32, #tpu.memory_space<vmem>>, vector<32x1xf32>
    %20 = vector.broadcast %19 : vector<32x1xf32> to vector<32x512xf32>
    %21 = arith.addf %18, %20 : vector<32x512xf32>
    %22 = math.tanh %21 : vector<32x512xf32>
    %c0_9 = arith.constant 0 : index
    %c0_10 = arith.constant 0 : index
    %23 = vector.load %arg6[%c0_9, %c0_10] : memref<4x32xf32, #tpu.memory_space<vmem>>, vector<4x32xf32>
    %cst_11 = arith.constant dense<0.000000e+00> : vector<4x512xf32>
    %24 = tpu.matmul %23, %22, %cst_11 {dimension_numbers = #tpu.dot_dimension_numbers<[1], [0], [0], [1], [0, 0, 1, 1], [], []>} : vector<4x32xf32>, vector<32x512xf32>, vector<4x512xf32> -> vector<4x512xf32>
    %c0_12 = arith.constant 0 : index
    %c0_13 = arith.constant 0 : index
    %25 = vector.load %arg7[%c0_12, %c0_13] : memref<4x512xf32, #tpu.memory_space<vmem>>, vector<4x512xf32>
    tpu.vector_store %arg7[%c0_12, %c0_13], %24 {strides = array<i32>} : memref<4x512xf32, #tpu.memory_space<vmem>>, vector<4x512xf32>,
    return
  }
  func.func @transform_0(%arg0: i32) -> (i32, i32) {
    %c0_i32 = arith.constant 0 : i32
    %c0_i32_0 = arith.constant 0 : i32
    return %c0_i32, %arg0 : i32, i32
  }
  func.func @transform_1(%arg0: i32) -> (i32, i32) {
    %c0_i32 = arith.constant 0 : i32
    %c0_i32_0 = arith.constant 0 : i32
    %c0_i32_1 = arith.constant 0 : i32
    return %c0_i32, %c0_i32_0 : i32, i32
  }
  func.func @transform_2(%arg0: i32) -> (i32, i32) {
    %c0_i32 = arith.constant 0 : i32
    %c0_i32_0 = arith.constant 0 : i32
    %c0_i32_1 = arith.constant 0 : i32
    return %c0_i32, %c0_i32_0 : i32, i32
  }
  func.func @transform_3(%arg0: i32) -> (i32, i32) {
    %c0_i32 = arith.constant 0 : i32
    %c0_i32_0 = arith.constant 0 : i32
    %c0_i32_1 = arith.constant 0 : i32
    return %c0_i32, %c0_i32_0 : i32, i32
  }
  func.func @transform_4(%arg0: i32) -> (i32, i32) {
    %c0_i32 = arith.constant 0 : i32
    %c0_i32_0 = arith.constant 0 : i32
    %c0_i32_1 = arith.constant 0 : i32
    return %c0_i32, %c0_i32_0 : i32, i32
  }
  func.func @transform_5(%arg0: i32) -> (i32, i32) {
    %c0_i32 = arith.constant 0 : i32
    %c0_i32_0 = arith.constant 0 : i32
    %c0_i32_1 = arith.constant 0 : i32
    return %c0_i32, %c0_i32_0 : i32, i32
  }
  func.func @transform_6(%arg0: i32) -> (i32, i32) {
    %c0_i32 = arith.constant 0 : i32
    %c0_i32_0 = arith.constant 0 : i32
    return %c0_i32, %arg0 : i32, i32
  }
}

</mosaic_0001>

<bundles_post_ra>
// kernel: mhn_forward.1
= control target key start
LH: loop header
LB: loop body
LE: loop exit
PB: predicated region body
PF: predicated region fallthrough
CT: control target
= control target key end

     0   :  { %11 = vsyncpa [#allocation3], 0  ;;  %s2002_s0 = inlined_call_operand.hbm [shape: f32[2,1024], index: 0, kind: input, shape index: {}]   ;;  %s2003_s1 = inlined_call_operand.hbm [shape: f32[32,2], index: 1, kind: input, shape index: {}]   ;;  %s2004_s2 = inlined_call_operand.hbm [shape: f32[32,1], index: 2, kind: input, shape index: {}]   ;;  %s2005_s3 = inlined_call_operand.hbm [shape: f32[32,32], index: 3, kind: input, shape index: {}]   ;;  %s2006_s4 = inlined_call_operand.hbm [shape: f32[32,1], index: 4, kind: input, shape index: {}]   ;;  %s2007_s5 = inlined_call_operand.hbm [shape: f32[4,32], index: 5, kind: input, shape index: {}]   ;;  %s2008_s6 = inlined_call_operand.hbm [shape: f32[4,1024], index: 6, kind: output, shape index: {}]  }
   0x1   :  { %13 = vsyncpa [#allocation3 + $0x1], 0 }
   0x2   :  { %14 = vsyncpa [#allocation6], 0 }
   0x3   :  { %15 = vsyncpa [#allocation9], 0 }
   0x4   :  { %16 = vsyncpa [#allocation12], 0 }
   0x5   :  { %17 = vsyncpa [#allocation4], 0 }
   0x6   :  { %19 = vsyncpa [#allocation4 + $0x1], 0  ;;  %s1622_s21 = smov 0   ;;  %s1624_s22 = smov 0  }
   0x7   :  { %s1626_s23 = smov 0   ;;  %s1628_s24 = smov 0  }
   0x8 LB: > { %s1575_s25 = smov [#allocation5]   ;;  %s1643_s27 = sadd.s32 4294967295, %s1573_s24   ;;  %s1573_s24 = sphi %s1628_s24, %s2033_s24   ;;  %s1569_s23 = sphi %s1626_s23, %s2032_s23   ;;  %s1565_s22 = sphi %s1624_s22, %s2031_s22   ;;  %s1561_s21 = sphi %s1622_s21, %s2030_s21  }
   0x9   : > { %s199_s26 = sshll.u32 %s1575_s25, 4  ;;  %p1084_p0 = scmp.ge.s32.totalorder %s1573_s24, 1  ;;  %s1648_s26 = int_to_ptr.vmem [resolvable:$true] %s199_s26 }
   0xa   : > { %p2009_p1 = scmp.eq.s32.totalorder %s1643_s27, 0  ;;  %p187_p2 = scmp.lt.s32.totalorder %s1573_s24, 3 }
   0xb   : > { %s1576_s29 = smov [#allocation8]   ;;  %s1577_s8 = smov [#allocation7]  }
   0xc   : > { %p1650_p3 = pnand %p1084_p0, %p187_p2  ;;  %s225_s30 = sshll.u32 %s1576_s29, 4  ;;  %s1663_s30 = int_to_ptr.vmem [resolvable:$true] %s225_s30 }
   0xd   : > { %s212_s9 = sshll.u32 %s1577_s8, 4  ;;  %s1325_s12 = scalar_lea.hbm %s2003_s1, 512  ;;  %s1665_s9 = int_to_ptr.vmem [resolvable:$true] %s212_s9 }
   0xe   : > { %s2012_s28 = scalar_select %p1650_p3, 1, 0 }
   0xf   : > { %p1175_p5 = pneg %p1650_p3  ;;  %p1326_p7 = scmp.ne.s32.totalorder %s2003_s1, %s1325_s12 }
  0x10   : > { %p1332_p11 = scmp.lt.u32.totalorder %s1325_s12, %s2003_s1 }
  0x11   : > { %p1659_p6 = pnand %p1175_p5, %p2009_p1 }
  0x13   : > { %p1675_p8 = pneg %p1659_p6 }
  0x15   : > { %p1328_p9 = pnand %p1675_p8, %p1326_p7 }
  0x17   : > { %p1329_p10 = pneg %p1328_p9 }
  0x19   : > { %p1334_p12 = pnand %p1332_p11, %p1329_p10 }
  0x1b   : > { %1337 = shalt.err (!%p1334_p12)
}
  0x1c   : > { %s1338_s18 = scalar_lea.vmem %s1648_s26, 512  ;;  %p1346_p5 = scmp.lt.s32.totalorder %s1648_s26, %s1648_s26 }
  0x1d   : > { %p1339_p13 = scmp.ne.s32.totalorder %s1648_s26, %s1338_s18  ;;  %p1347_p4 = scmp.lt.s32.totalorder %s1338_s18, %s1338_s18 }
  0x1f   : > { %p1341_p0 = pnand %p1339_p13, %p1675_p8  ;;  %p1348_p7 = por %p1347_p4, %p1346_p5 }
  0x21   : > { %p1342_p2 = pneg %p1341_p0 }
  0x23   : > { %p1349_p9 = pnand %p1348_p7, %p1342_p2 }
  0x25   : > { %1352 = shalt.err (!%p1349_p9)
}
  0x26   : > { %s1578_s19 = smov 128   ;;  %s1579_s20 = smov 8  }
  0x27   : > { %1178 = dma.hbm_to_vmem [thread:$0]  (!%p1659_p6), %s2003_s1, 512, %s1648_s26, [#allocation6], %s1578_s19, %s1578_s19, %s1579_s20  }
  0x28   : > { %s1353_s11 = scalar_lea.hbm %s2005_s3, 512 }
  0x29   : > { %p1354_p4 = scmp.ne.s32.totalorder %s2005_s3, %s1353_s11  ;;  %p1360_p12 = scmp.lt.u32.totalorder %s1353_s11, %s2005_s3 }
  0x2b   : > { %p1356_p10 = pnand %p1354_p4, %p1675_p8 }
  0x2d   : > { %p1357_p11 = pneg %p1356_p10 }
  0x2f   : > { %p1362_p13 = pnand %p1360_p12, %p1357_p11 }
  0x31   : > { %1365 = shalt.err (!%p1362_p13)
}
  0x32   : > { %s1366_s26 = scalar_lea.vmem %s1663_s30, 512  ;;  %p1374_p7 = scmp.lt.s32.totalorder %s1663_s30, %s1663_s30 }
  0x33   : > { %p1367_p0 = scmp.ne.s32.totalorder %s1663_s30, %s1366_s26  ;;  %p1375_p9 = scmp.lt.s32.totalorder %s1366_s26, %s1366_s26 }
  0x35   : > { %p1369_p2 = pnand %p1367_p0, %p1675_p8  ;;  %p1376_p4 = por %p1375_p9, %p1374_p7 }
  0x37   : > { %p1370_p5 = pneg %p1369_p2 }
  0x39   : > { %p1377_p10 = pnand %p1376_p4, %p1370_p5 }
  0x3b   : > { %1380 = shalt.err (!%p1377_p10)
}
  0x3c   : > { %1184 = dma.hbm_to_vmem [thread:$0]  (!%p1659_p6), %s2005_s3, 512, %s1663_s30, [#allocation9], %s1578_s19, %s1578_s19, %s1579_s20  }
  0x3d   : > { %s1381_s8 = scalar_lea.hbm %s2004_s2, 512 }
  0x3e   : > { %p1382_p11 = scmp.ne.s32.totalorder %s2004_s2, %s1381_s8  ;;  %p1388_p0 = scmp.lt.u32.totalorder %s1381_s8, %s2004_s2 }
  0x40   : > { %p1384_p12 = pnand %p1382_p11, %p1675_p8 }
  0x42   : > { %p1385_p13 = pneg %p1384_p12 }
  0x44   : > { %p1390_p2 = pnand %p1388_p0, %p1385_p13 }
  0x46   : > { %1393 = shalt.err (!%p1390_p2)
}
  0x47   : > { %s1394_s30 = scalar_lea.vmem %s1665_s9, 512  ;;  %p1402_p4 = scmp.lt.s32.totalorder %s1665_s9, %s1665_s9 }
  0x48   : > { %p1395_p5 = scmp.ne.s32.totalorder %s1665_s9, %s1394_s30  ;;  %p1403_p10 = scmp.lt.s32.totalorder %s1394_s30, %s1394_s30 }
  0x4a   : > { %p1397_p7 = pnand %p1395_p5, %p1675_p8  ;;  %p1404_p11 = por %p1403_p10, %p1402_p4 }
  0x4c   : > { %p1398_p9 = pneg %p1397_p7 }
  0x4e   : > { %p1405_p12 = pnand %p1404_p11, %p1398_p9 }
  0x50   : > { %1408 = shalt.err (!%p1405_p12)
}
  0x51   : > { %1181 = dma.hbm_to_vmem [thread:$0]  (!%p1659_p6), %s2004_s2, 512, %s1665_s9, [#allocation6], %s1578_s19, %s1578_s19, %s1579_s20  }
  0x52   : > { %s1580_s26 = smov [#allocation10]   ;;  %s1581_s18 = smov [#allocation11]  }
  0x53   : > { %s238_s17 = sshll.u32 %s1580_s26, 4  ;;  %s252_s25 = sshll.u32 %s1581_s18, 4  ;;  %s239_s17 = int_to_ptr.vmem [resolvable:$true] %s238_s17  ;;  %s253_s25 = int_to_ptr.vmem [resolvable:$true] %s252_s25 }
  0x54   : > { %s1409_s10 = scalar_lea.hbm %s2006_s4, 512 }
  0x55   : > { %p1410_p13 = scmp.ne.s32.totalorder %s2006_s4, %s1409_s10  ;;  %p1416_p5 = scmp.lt.u32.totalorder %s1409_s10, %s2006_s4 }
  0x57   : > { %p1412_p0 = pnand %p1410_p13, %p1675_p8 }
  0x59   : > { %p1413_p2 = pneg %p1412_p0 }
  0x5b   : > { %p1418_p7 = pnand %p1416_p5, %p1413_p2 }
  0x5d   : > { %1421 = shalt.err (!%p1418_p7)
}
  0x5e   : > { %s1422_s9 = scalar_lea.vmem %s239_s17, 512  ;;  %p1430_p11 = scmp.lt.s32.totalorder %s239_s17, %s239_s17 }
  0x5f   : > { %p1423_p9 = scmp.ne.s32.totalorder %s239_s17, %s1422_s9  ;;  %p1431_p12 = scmp.lt.s32.totalorder %s1422_s9, %s1422_s9 }
  0x61   : > { %p1425_p4 = pnand %p1423_p9, %p1675_p8  ;;  %p1432_p1 = por %p1431_p12, %p1430_p11 }
  0x63   : > { %p1426_p10 = pneg %p1425_p4 }
  0x65   : > { %p1433_p3 = pnand %p1432_p1, %p1426_p10 }
  0x67   : > { %1436 = shalt.err (!%p1433_p3)
}
  0x68   : > { %1187 = dma.hbm_to_vmem [thread:$0]  (!%p1659_p6), %s2006_s4, 512, %s239_s17, [#allocation9], %s1578_s19, %s1578_s19, %s1579_s20  }
  0x69   : > { %s1437_s29 = scalar_lea.hbm %s2007_s5, 64 }
  0x6a   : > { %p1438_p1 = scmp.ne.s32.totalorder %s2007_s5, %s1437_s29  ;;  %p1444_p0 = scmp.lt.u32.totalorder %s1437_s29, %s2007_s5 }
  0x6c   : > { %p1440_p3 = pnand %p1438_p1, %p1675_p8 }
  0x6e   : > { %p1441_p13 = pneg %p1440_p3 }
  0x70   : > { %p1446_p2 = pnand %p1444_p0, %p1441_p13 }
  0x72   : > { %1449 = shalt.err (!%p1446_p2)
}
  0x73   : > { %s1450_s13 = scalar_lea.vmem %s253_s25, 64  ;;  %p1458_p4 = scmp.lt.s32.totalorder %s253_s25, %s253_s25 }
  0x74   : > { %p1451_p5 = scmp.ne.s32.totalorder %s253_s25, %s1450_s13  ;;  %p1459_p10 = scmp.lt.s32.totalorder %s1450_s13, %s1450_s13 }
  0x76   : > { %p1453_p7 = pnand %p1451_p5, %p1675_p8  ;;  %p1460_p11 = por %p1459_p10, %p1458_p4 }
  0x78   : > { %p1454_p9 = pneg %p1453_p7 }
  0x7a   : > { %p1461_p12 = pnand %p1460_p11, %p1454_p9 }
  0x7c   : > { %1464 = shalt.err (!%p1461_p12)
}
  0x7d   : > { %1190 = dma.hbm_to_vmem [thread:$0]  (!%p1659_p6), %s2007_s5, 64, %s253_s25, [#allocation12]  }
  0x7e   : > { %s1083_s15 = sadd.s32 4294967294, %s1573_s24   ;;  %s1792_s7 = sadd.s32 1, %s1573_s24  }
  0x7f   : > { %s32_s17 = sadd.s32 1, %s1569_s23  ;;  %s29_s30 = ssub.s32 %s1573_s24, %s1792_s7 }
  0x80   : > { %p39_p8 = scmp.ne.s32.totalorder %s1569_s23, %s1565_s22  ;;  %p30_p1 = scmp.eq.s32.totalorder %s29_s30, 0 }
  0x81   : > { %p40_p3 = scmp.eq.s32.totalorder %s1573_s24, 0  ;;  %p45_p13 = scmp.ne.s32.totalorder %s1565_s22, %s1561_s21 }
  0x82   : > { %p174_p0 = scmp.eq.s32.totalorder %s1643_s27, 1  ;;  %p2015_p5 = scmp.eq.s32.totalorder %s1643_s27, 0 }
  0x83   : > { %s1804_s9 = scalar_select %p30_p1, %s1569_s23, %s32_s17  }
  0x84   : > { %p41_p2 = por %p40_p3, %p39_p8  ;;  %p1808_p7 = por %p2015_p5, %p45_p13 }
  0x85   : > { %p1812_p6 = por %p174_p0, %p39_p8  ;;  %p180_p9 = scmp.eq.s32.totalorder %s1083_s15, 1 }
  0x86   : > { %p1204_p4 = scmp.lt.s32.totalorder %s1573_s24, 2  ;;  %s263_s16 = sand.u32 1, %s1569_s23  }
  0x87   : > { %s2017_s25 = scalar_select %p1812_p6, 1, 0 }
  0x88   : > { %p1818_p10 = por %p180_p9, %p45_p13  ;;  %s1091_s18 = sshll.u32 %s263_s16, 3 }
  0x89   : > { %s1117_s29 = sshll.u32 %s1573_s24, 7  ;;  %s267_s12 = scalar_lea.vmem [#allocation2], %s1091_s18 }
  0x8a   : > { %s2018_s26 = scalar_select %p1818_p10, 1, 0 }
  0x8b   : > { %s1826_s11 = scalar_lea.hbm %s2002_s0, %s1117_s29  ;;  %s275_s13 = sshll.u32 %s267_s12, 4  ;;  %s1832_s13 = int_to_ptr.vmem [resolvable:$true] %s275_s13 }
  0x8c   : > { %p1828_p11 = pnand %p1204_p4, %p41_p2  ;;  %s264_s20 = scalar_lea.sflag [#allocation3], %s263_s16 }
  0x8d   : > { %s1465_s15 = scalar_lea.hbm %s1826_s11, 128  ;;  %s1470_s18 = scalar_lea.hbm %s2002_s0, 256 }
  0x8e   : > { %p1466_p12 = scmp.ne.s32.totalorder %s1826_s11, %s1465_s15  ;;  %p1467_p8 = pneg %p1828_p11 }
  0x8f   : > { %p1471_p13 = scmp.lt.u32.totalorder %s1826_s11, %s2002_s0  ;;  %p1472_p0 = scmp.lt.u32.totalorder %s1470_s18, %s1465_s15 }
  0x90   : > { %p1468_p1 = pnand %p1467_p8, %p1466_p12  ;;  %p1474_p5 = scmp.lt.u32.totalorder %s1465_s15, %s1826_s11 }
  0x91   : > { %p1473_p2 = por %p1472_p0, %p1471_p13 }
  0x92   : > { %p1469_p3 = pneg %p1468_p1 }
  0x93   : > { %p1475_p9 = por %p1474_p5, %p1473_p2 }
  0x95   : > { %p1476_p4 = pnand %p1475_p9, %p1469_p3 }
  0x97   : > { %1479 = shalt.err (!%p1476_p4)
}
  0x98   : > { %s1480_s16 = scalar_lea.vmem %s1832_s13, 128  ;;  %s1582_s10 = smov [#allocation2]  }
  0x99   : > { %p1481_p12 = scmp.ne.s32.totalorder %s1832_s13, %s1480_s16  ;;  %s1485_s12 = sshll.u32 %s1582_s10, 4  ;;  %s1486_s12 = int_to_ptr.vmem [resolvable:$false] %s1485_s12 }
  0x9a   : > { %s1487_s17 = scalar_lea.vmem %s1486_s12, 256  ;;  %p1488_p6 = scmp.lt.s32.totalorder %s1832_s13, %s1486_s12 }
  0x9b   : > { %p1483_p1 = pnand %p1481_p12, %p1467_p8  ;;  %p1489_p13 = scmp.lt.s32.totalorder %s1487_s17, %s1480_s16 }
  0x9d   : > { %p1484_p10 = pneg %p1483_p1  ;;  %p1490_p0 = por %p1489_p13, %p1488_p6 }
  0x9f   : > { %p1491_p2 = pnand %p1490_p0, %p1484_p10 }
  0xa1   : > { %1494 = shalt.err (!%p1491_p2)
}
  0xa2   : > { %1194 = dma.hbm_to_vmem [thread:$0]  (!%p1828_p11), %s1826_s11, 128, %s1832_s13, %s264_s20  }
  0xa3   : > { %p2020_p3 = scmp.ne.s32.totalorder %s2012_s28, 0 }
  0xa4   : > { %s1862_s15 = sand.u32 (!%p2020_p3), 1, %s1565_s22  }
  0xa5   : > { %284 = sbr.rel (%p2020_p3) target bundleno = 836 (0x344), region = 44  ;;  %s1095_s30 = sshll.u32 (!%p2020_p3), %s1862_s15, 3 }
  0xa6   : > { %s287_s18 = scalar_lea.sflag (!%p2020_p3), [#allocation3], %s1862_s15  ;;  %s1866_s29 = scalar_lea.vmem (!%p2020_p3), [#allocation2], %s1095_s30 }
  0xac   : > { %1540 = dma.done.wait (%p1808_p7), %s287_s18, 128  }
  0xad   : > { %1542 = vsyncadd (%p1808_p7), %s287_s18, 4294967168  ;;  %p2021_p6 = scmp.eq.s32.totalorder %s1643_s27, 0 }
  0xaf   : > { %1544 = dma.done.wait (%p2021_p6), [#allocation6], 1024   ;;  %p2022_p10 = pmov %p2021_p6 }
  0xb0   : > { %p2023_p11 = pmov %p2021_p6 }
  0xb1   : > { %1546 = vsyncadd (%p2022_p10), [#allocation6], 4294966272 }
  0xb2   : > { %1548 = dma.done.wait (%p2023_p11), [#allocation9], 1024   ;;  %p2024_p8 = pmov %p2021_p6 }
  0xb3   : > { %p2025_p5 = pmov %p2021_p6 }
  0xb4   : > { %1550 = vsyncadd (%p2024_p8), [#allocation9], 4294966272 }
  0xb5   : > { %1552 = dma.done.wait (%p2025_p5), [#allocation12], 64   ;;  %p2026_p9 = pmov %p2025_p5 }
  0xb6   : > { %v1583_v0 = vmov 0   ;;  %v346_v1 = vld [vmem:[#allocation7] sm:$0xff]  ;;  %v347_v3 = vld [vmem:[#allocation7 + $0x8] sm:$0xff]  ;;  %v345_v5 = vld [vmem:[#allocation5 + $0x18] sm:$0xff]  ;;  %v1584_v6 = vmov 1   ;;  %v1585_v10 = vmov 0.0   ;;  %v371_v15 = vlaneseq }
  0xb7   : > { %1554 = vsyncadd (%p2026_p9), [#allocation12], 4294967232  ;;  %1254 = vset.pattern.permute.xlu1 %v1583_v0  ;;  %1253 = vset.pattern.permute.xlu0 %v1583_v0  ;;  %v342_v2 = vld [vmem:[#allocation5] sm:$0xff]  ;;  %v343_v4 = vld [vmem:[#allocation5 + $0x8] sm:$0xff]  ;;  %vm587_vm0 = vcmask 261120   ;;  %s1101_s28 = sshll.u32 %s1862_s15, 4 }
  0xb8   : > { %425 = vperm.xlu1 %1254, %v346_v1   ;;  %352 = vperm.xlu0 %1253, %v342_v2   ;;  %v344_v7 = vld [vmem:[#allocation5 + $0x10] sm:$0xff]  ;;  %v349_v9 = vld [vmem:[#allocation7 + $0x18] sm:$0xff]  ;;  %v563_v11 = vld [vmem:[#allocation10] sm:$0xff]  ;;  %v372_v16 = vshrl.u32 %v371_v15, 7  ;;  %s1118_s14 = sshll.u32 %s1643_s27, 8  ;;  %s338_s11 = scalar_lea.vmem [#allocation13], %s1101_s28 }
  0xb9   : > { %v348_v8 = vld [vmem:[#allocation7 + $0x10] sm:$0xff]  ;;  %664 = vmatprep.mubr.f32.mxu0 %v1585_v10  ;;  %753 = vmatprep.mubr.f32.mxu1 %v1585_v10  ;;  %v564_v12 = vld [vmem:[#allocation10 + $0x8] sm:$0xff]  ;;  %v566_v14 = vld [vmem:[#allocation10 + $0x18] sm:$0xff]  ;;  %s965_s13 = sshll.u32 %s338_s11, 4  ;;  %s1958_s8 = scalar_lea.hbm %s2008_s6, %s1118_s14  ;;  %s1960_s13 = int_to_ptr.vmem [resolvable:$true] %s965_s13 }
  0xba   : > { %v565_v13 = vld [vmem:[#allocation10 + $0x10] sm:$0xff]  ;;  %v373_v17 = vsub.s32 0, %v372_v16  ;;  %v377_v18 = vsub.s32 2, %v372_v16  ;;  %v381_v19 = vsub.s32 4, %v372_v16  ;;  %v385_v21 = vsub.s32 6, %v372_v16  ;;  %s951_s16 = scalar_lea.sflag [#allocation4], %s1862_s15 }
  0xbb   : > { %v341_v20 = vld [vmem:[%s1866_s29] sm:$0xff]  ;;  %v477_v22 = vsub.s32 1, %v372_v16  ;;  %v481_v23 = vsub.s32 3, %v372_v16  ;;  %v485_v24 = vsub.s32 5, %v372_v16  ;;  %v489_v25 = vsub.s32 7, %v372_v16  ;;  %s1495_s27 = scalar_lea.vmem %s1960_s13, 256 }
  0xbc   : > { %430 = vperm.xlu1 %1254, %v347_v3   ;;  %357 = vperm.xlu0 %1253, %v343_v4   ;;  %v374_v26 = vrot.slane %v341_v20, %v373_v17  ;;  %v378_v27 = vrot.slane %v341_v20, %v377_v18  ;;  %v382_v28 = vrot.slane %v341_v20, %v381_v19  ;;  %p1496_p7 = scmp.ne.s32.totalorder %s1960_s13, %s1495_s27  ;;  %p2027_p4 = scmp.ne.s32.totalorder %s2017_s25, 0 }
  0xbd   : > { %v386_v31 = vrot.slane %v341_v20, %v385_v21  ;;  %v478_v32 = vrot.slane %v341_v20, %v477_v22  ;;  %v482_v33 = vrot.slane %v341_v20, %v481_v23  ;;  %v486_v34 = vrot.slane %v341_v20, %v485_v24  ;;  %s1586_s10 = smov [#allocation13]  }
  0xbe   : > { %v490_v35 = vrot.slane %v341_v20, %v489_v25  ;;  %v1887_v36 = vrot.slane %v374_v26, %v373_v17  ;;  %v1889_v37 = vrot.slane %v378_v27, %v373_v17  ;;  %v1891_v38 = vrot.slane %v382_v28, %v373_v17  ;;  %p1497_p12 = pnand %p1496_p7, %p2027_p4  ;;  %s1499_s12 = sshll.u32 %s1586_s10, 4  ;;  %s1500_s12 = int_to_ptr.vmem [resolvable:$false] %s1499_s12 }
  0xbf   : > { %v1893_v41 = vrot.slane %v386_v31, %v373_v17  ;;  %v1898_v45 = vrot.slane %v478_v32, %v477_v22  ;;  %v1900_v46 = vrot.slane %v482_v33, %v477_v22  ;;  %v1902_v47 = vrot.slane %v486_v34, %v477_v22  ;;  %s1501_s17 = scalar_lea.vmem %s1500_s12, 512  ;;  %p1502_p13 = scmp.lt.s32.totalorder %s1960_s13, %s1500_s12 }
  0xc0   : > { %1255 = vset.pattern.permute.xlu1 %v1584_v6  ;;  %367 = vperm.xlu0 %1253, %v345_v5   ;;  %v1904_v48 = vrot.slane %v490_v35, %v477_v22  ;;  %p1498_p1 = pneg %p1497_p12  ;;  %p1503_p0 = scmp.lt.s32.totalorder %s1501_s17, %s1495_s27 }
  0xc1   : > { %464 = vperm.xlu1 %1255, %v343_v4  }
  0xc2   : > { %p1504_p2 = por %p1503_p0, %p1502_p13 }
  0xc4   : > { %1257 = vset.pattern.permute.xlu0 %v1584_v6  ;;  %p1505_p3 = pnand %p1504_p2, %p1498_p1 }
  0xc5   : > { %1256 = vset.pattern.permute.xlu1 %v1583_v0  ;;  %460 = vperm.xlu0 %1257, %v342_v2  }
  0xc6   : > { %362 = vperm.xlu1 %1256, %v344_v7  }
  0xc9   : > { %468 = vperm.xlu0 %1257, %v344_v7  }
  0xca   : > { %435 = vperm.xlu1 %1256, %v348_v8  }
  0xcd   : > { %1260 = vset.pattern.permute.xlu0 %v1583_v0 }
  0xce   : > { %440 = vperm.xlu1 %1256, %v349_v9   ;;  %574 = vperm.xlu0 %1260, %v564_v12  }
  0xd2   : > { %1258 = vset.pattern.permute.xlu1 %v1584_v6 }
  0xd3   : > { %472 = vperm.xlu1 %1258, %v345_v5  }
  0xd7   : > { %1259 = vset.pattern.permute.xlu1 %v1583_v0 }
  0xd8   : > { %569 = vperm.xlu1 %1259, %v563_v11  }
  0xdc   : > { %579 = vperm.xlu1 %1259, %v565_v13  }
  0xe0   : > { %584 = vperm.xlu1 %1259, %v566_v14  }
 0x137   : > { %v426_v29 = vpop.permute.xlu1 %425  ;;  %v353_v30 = vpop.permute.xlu0 %352 }
 0x138   : > { %v407_v50 = vmul.f32 %v1887_v36, %v353_v30  ;;  %v408_v51 = vmul.f32 %v1889_v37, %v353_v30  ;;  %v409_v53 = vmul.f32 %v1891_v38, %v353_v30  ;;  %v410_v62 = vmul.f32 %v1893_v41, %v353_v30 }
 0x13a   : > { %v443_v3 = vadd.f32 %v426_v29, %v407_v50  ;;  %v444_v4 = vadd.f32 %v426_v29, %v408_v51  ;;  %v445_v5 = vadd.f32 %v426_v29, %v409_v53  ;;  %v446_v13 = vadd.f32 %v426_v29, %v410_v62 }
 0x13b   : > { %v431_v39 = vpop.permute.xlu1 %430  ;;  %v358_v40 = vpop.permute.xlu0 %357 }
 0x13c   : > { %v411_v42 = vmul.f32 %v1887_v36, %v358_v40  ;;  %v412_v43 = vmul.f32 %v1889_v37, %v358_v40  ;;  %v413_v44 = vmul.f32 %v1891_v38, %v358_v40  ;;  %v414_v49 = vmul.f32 %v1893_v41, %v358_v40 }
 0x13e   : > { %v447_v54 = vadd.f32 %v431_v39, %v411_v42  ;;  %v448_v55 = vadd.f32 %v431_v39, %v412_v43  ;;  %v449_v56 = vadd.f32 %v431_v39, %v413_v44  ;;  %v450_v63 = vadd.f32 %v431_v39, %v414_v49 }
 0x13f   : > { %v368_v52 = vpop.permute.xlu0 %367 }
 0x140   : > { %v465_v57 = vpop.permute.xlu1 %464  ;;  %v419_v42 = vmul.f32 %v1887_v36, %v368_v52  ;;  %v420_v43 = vmul.f32 %v1889_v37, %v368_v52  ;;  %v421_v44 = vmul.f32 %v1891_v38, %v368_v52  ;;  %v422_v51 = vmul.f32 %v1893_v41, %v368_v52 }
 0x141   : > { %v515_v58 = vmul.f32 %v1898_v45, %v465_v57  ;;  %v516_v59 = vmul.f32 %v1900_v46, %v465_v57  ;;  %v517_v60 = vmul.f32 %v1902_v47, %v465_v57  ;;  %v518_v61 = vmul.f32 %v1904_v48, %v465_v57 }
 0x143   : > { %v531_v0 = vadd.f32 %v515_v58, %v447_v54  ;;  %v532_v1 = vadd.f32 %v516_v59, %v448_v55  ;;  %v533_v2 = vadd.f32 %v517_v60, %v449_v56  ;;  %v534_v6 = vadd.f32 %v518_v61, %v450_v63 }
 0x144   : > { %v461_v7 = vpop.permute.xlu0 %460 }
 0x145   : > { %1261 = vtanh.f32 %v531_v0  ;;  %v511_v8 = vmul.f32 %v1898_v45, %v461_v7  ;;  %v512_v9 = vmul.f32 %v1900_v46, %v461_v7  ;;  %v513_v11 = vmul.f32 %v1902_v47, %v461_v7  ;;  %v363_v12 = vpop.permute.xlu1 %362 }
 0x146   : > { %1263 = vtanh.f32 %v532_v1  ;;  %v514_v14 = vmul.f32 %v1904_v48, %v461_v7  ;;  %v415_v19 = vmul.f32 %v1887_v36, %v363_v12  ;;  %v416_v20 = vmul.f32 %v1889_v37, %v363_v12 }
 0x147   : > { %1265 = vtanh.f32 %v533_v2  ;;  %v527_v15 = vadd.f32 %v511_v8, %v443_v3  ;;  %v528_v16 = vadd.f32 %v512_v9, %v444_v4  ;;  %v529_v17 = vadd.f32 %v513_v11, %v445_v5 }
 0x148   : > { %1267 = vtanh.f32 %v534_v6  ;;  %v530_v18 = vadd.f32 %v514_v14, %v446_v13  ;;  %v469_v21 = vpop.permute.xlu0 %468  ;;  %v417_v22 = vmul.f32 %v1891_v38, %v363_v12  ;;  %v418_v28 = vmul.f32 %v1893_v41, %v363_v12 }
 0x149   : > { %1269 = vtanh.f32 %v527_v15  ;;  %v436_v23 = vpop.permute.xlu1 %435  ;;  %v519_v24 = vmul.f32 %v1898_v45, %v469_v21  ;;  %v520_v27 = vmul.f32 %v1900_v46, %v469_v21  ;;  %v521_v30 = vmul.f32 %v1902_v47, %v469_v21 }
 0x14a   : > { %1271 = vtanh.f32 %v528_v16  ;;  %v451_v25 = vadd.f32 %v436_v23, %v415_v19  ;;  %v452_v26 = vadd.f32 %v436_v23, %v416_v20  ;;  %v453_v29 = vadd.f32 %v436_v23, %v417_v22  ;;  %v559_v16 = vld [vmem:[#allocation8] sm:$0xff]  ;;  %v562_v19 = vld [vmem:[#allocation8 + $0x18] sm:$0xff] }
 0x14b   : > { %1273 = vtanh.f32 %v529_v17  ;;  %v454_v31 = vadd.f32 %v436_v23, %v418_v28  ;;  %v522_v32 = vmul.f32 %v1904_v48, %v469_v21  ;;  %v560_v17 = vld [vmem:[#allocation8 + $0x8] sm:$0xff] }
 0x14c   : > { %1275 = vtanh.f32 %v530_v18  ;;  %v535_v33 = vadd.f32 %v519_v24, %v451_v25  ;;  %v536_v35 = vadd.f32 %v520_v27, %v452_v26  ;;  %v537_v49 = vadd.f32 %v521_v30, %v453_v29  ;;  %v561_v18 = vld [vmem:[#allocation8 + $0x10] sm:$0xff] }
 0x14d   : > { %v441_v34 = vpop.permute.xlu1 %440  ;;  %v538_v53 = vadd.f32 %v522_v32, %v454_v31  ;;  %v575_v26 = vpop.permute.xlu0 %574 }
 0x14e   : > { %1277 = vtanh.f32 %v535_v33  ;;  %v455_v55 = vadd.f32 %v441_v34, %v419_v42  ;;  %v456_v56 = vadd.f32 %v441_v34, %v420_v43  ;;  %v457_v57 = vadd.f32 %v441_v34, %v421_v44 }
 0x14f   : > { %v1262_v39 = vpop.eup %1261  ;;  %1279 = vtanh.f32 %v536_v35  ;;  %v458_v41 = vadd.f32 %v441_v34, %v422_v51 }
 0x150   : > { %v1264_v40 = vpop.eup %1263  ;;  %1281 = vtanh.f32 %v537_v49 }
 0x151   : > { %v1266_v50 = vpop.eup %1265  ;;  %1283 = vtanh.f32 %v538_v53 }
 0x152   : > { %v1268_v54 = vpop.eup %1267  ;;  %v473_v58 = vpop.permute.xlu1 %472 }
 0x153   : > { %v1270_v59 = vpop.eup %1269  ;;  %v523_v60 = vmul.f32 %v1898_v45, %v473_v58  ;;  %v524_v36 = vmul.f32 %v1900_v46, %v473_v58  ;;  %v525_v37 = vmul.f32 %v1902_v47, %v473_v58  ;;  %v526_v38 = vmul.f32 %v1904_v48, %v473_v58 }
 0x154   : > { %v1272_v61 = vpop.eup %1271  ;;  %v1121_v1 = vpack.c.bf16 %v1262_v39, %v1270_v59 }
 0x155   : > { %v1274_v52 = vpop.eup %1273  ;;  %v539_v62 = vadd.f32 %v523_v60, %v455_v55  ;;  %v540_v63 = vadd.f32 %v524_v36, %v456_v56  ;;  %v541_v0 = vadd.f32 %v525_v37, %v457_v57  ;;  %v542_v3 = vadd.f32 %v526_v38, %v458_v41 }
 0x156   : > { %v1276_v2 = vpop.eup %1275  ;;  %v1119_v4 = vpack.c.bf16 %v1264_v40, %v1272_v61  ;;  %v1129_v5 = vpack.c.bf16 %v1266_v50, %v1274_v52 }
 0x157   : > { %1285 = vtanh.f32 %v539_v62  ;;  %v1127_v45 = vpack.c.bf16 %v1268_v54, %v1276_v2  ;;  %v570_v20 = vpop.permute.xlu1 %569 }
 0x158   : > { %1287 = vtanh.f32 %v540_v63  ;;  %1120 = vmatprep.subr.bf16.mxu0 %v1119_v4  ;;  %v1278_v46 = vpop.eup %1277 }
 0x159   : > { %1289 = vtanh.f32 %v541_v0  ;;  %1128 = vmatprep.subr.bf16.mxu1 %v1127_v45  ;;  %1122 = vmatpush1.bf16.msra.mxu0 %v1121_v1  ;;  %v1280_v47 = vpop.eup %1279 }
 0x15a   : > { %1291 = vtanh.f32 %v542_v3  ;;  %1130 = vmatpush1.bf16.msra.mxu1 %v1129_v5  ;;  %v1282_v48 = vpop.eup %1281 }
 0x15b   : > { %v1284_v6 = vpop.eup %1283  ;;  %v580_v33 = vpop.permute.xlu1 %579 }
 0x15f   : > { %v585_v54 = vpop.permute.xlu1 %584 }
 0x161   : > { %v1286_v7 = vpop.eup %1285 }
 0x162   : > { %v1288_v8 = vpop.eup %1287  ;;  %v1125_v9 = vpack.c.bf16 %v1286_v7, %v1278_v46 }
 0x163   : > { %v1290_v11 = vpop.eup %1289  ;;  %v1123_v12 = vpack.c.bf16 %v1288_v8, %v1280_v47 }
 0x164   : > { %v1292_v13 = vpop.eup %1291  ;;  %v1133_v14 = vpack.c.bf16 %v1290_v11, %v1282_v48 }
 0x165   : > { %1124 = vmatprep.subr.bf16.mxu0 %v1123_v12  ;;  %v1131_v15 = vpack.c.bf16 %v1292_v13, %v1284_v6 }
 0x166   : > { %1126 = vmatpush1.bf16.msra.mxu0 %v1125_v9 }
 0x167   : > { %1132 = vmatprep.subr.bf16.mxu1 %v1131_v15 }
 0x168   : > { %1134 = vmatpush1.bf16.msra.mxu1 %v1133_v14 }
 0x169   : > { %1102 = vmatmul.mubr.msk.f32.vlgmr.msra.gmra.mrb[0].mxu0 %vm587_vm0, %v559_v16 }
 0x16a   : > { %670 = vmatprep.mubr.f32.mxu0 %v1585_v10 }
 0x16b   : > { %1106 = vmatmul.mubr.msk.f32.vlgmr.msra.gmra.mrb[0].mxu1 %vm587_vm0, %v559_v16  ;;  %v794_v16 = vld [vmem:[#allocation11] sm:$0xf] }
 0x16c   : > { %759 = vmatprep.mubr.f32.mxu1 %v1585_v10 }
 0x16d   : > { %1103 = vmatmul.mubr.msk.f32.gmra.mrb[2].mxu0 %vm587_vm0, %v560_v17 }
 0x16e   : > { %676 = vmatprep.mubr.f32.mxu0 %v1585_v10 }
 0x16f   : > { %1107 = vmatmul.mubr.msk.f32.gmra.mrb[2].mxu1 %vm587_vm0, %v560_v17 }
 0x170   : > { %765 = vmatprep.mubr.f32.mxu1 %v1585_v10 }
 0x171   : > { %1104 = vmatmul.mubr.msk.f32.gmra.mrb[4].mxu0 %vm587_vm0, %v561_v18 }
 0x172   : > { %682 = vmatprep.mubr.f32.mxu0 %v1585_v10 }
 0x173   : > { %1108 = vmatmul.mubr.msk.f32.gmra.mrb[4].mxu1 %vm587_vm0, %v561_v18 }
 0x174   : > { %771 = vmatprep.mubr.f32.mxu1 %v1585_v10 }
 0x175   : > { %1105 = vmatmul.mubr.msk.f32.gmra.mrb[6].mxu0 %vm587_vm0, %v562_v19 }
 0x176   : > { %862 = vmatprep.mubr.f32.mxu0 %v1585_v10 }
 0x177   : > { %1109 = vmatmul.mubr.msk.f32.gmra.mrb[6].mxu1 %vm587_vm0, %v562_v19 }
 0x178   : > { %933 = vmatprep.mubr.f32.mxu1 %v1585_v10 }
 0x23c   : > { %v666_v21 = vpop.f32.mrb[0].mxu0 }
 0x23d   : > { %v667_v22 = vadd.f32 %v666_v21, %v570_v20  ;;  %v668_v23 = vpop.f32.mrb[1].mxu0 }
 0x23e   : > { %v755_v24 = vpop.f32.mrb[0].mxu1  ;;  %v669_v25 = vadd.f32 %v668_v23, %v570_v20 }
 0x23f   : > { %1293 = vtanh.f32 %v667_v22  ;;  %v756_v27 = vadd.f32 %v755_v24, %v570_v20  ;;  %v757_v28 = vpop.f32.mrb[1].mxu1 }
 0x240   : > { %1295 = vtanh.f32 %v669_v25  ;;  %v758_v29 = vadd.f32 %v757_v28, %v570_v20  ;;  %v672_v30 = vpop.f32.mrb[2].mxu0 }
 0x241   : > { %1297 = vtanh.f32 %v756_v27  ;;  %v673_v31 = vadd.f32 %v672_v30, %v575_v26  ;;  %v674_v32 = vpop.f32.mrb[3].mxu0 }
 0x242   : > { %1299 = vtanh.f32 %v758_v29  ;;  %v761_v34 = vpop.f32.mrb[2].mxu1  ;;  %v675_v10 = vadd.f32 %v674_v32, %v575_v26 }
 0x243   : > { %1301 = vtanh.f32 %v673_v31  ;;  %v762_v35 = vadd.f32 %v761_v34, %v575_v26  ;;  %v763_v39 = vpop.f32.mrb[3].mxu1 }
 0x244   : > { %1303 = vtanh.f32 %v675_v10  ;;  %v764_v40 = vadd.f32 %v763_v39, %v575_v26  ;;  %v678_v42 = vpop.f32.mrb[4].mxu0 }
 0x245   : > { %1305 = vtanh.f32 %v762_v35  ;;  %v679_v43 = vadd.f32 %v678_v42, %v580_v33  ;;  %v680_v44 = vpop.f32.mrb[5].mxu0 }
 0x246   : > { %1307 = vtanh.f32 %v764_v40  ;;  %v767_v49 = vpop.f32.mrb[4].mxu1  ;;  %v681_v50 = vadd.f32 %v680_v44, %v580_v33 }
 0x247   : > { %1309 = vtanh.f32 %v679_v43  ;;  %v768_v51 = vadd.f32 %v767_v49, %v580_v33  ;;  %v769_v53 = vpop.f32.mrb[5].mxu1 }
 0x248   : > { %1311 = vtanh.f32 %v681_v50  ;;  %v770_v55 = vadd.f32 %v769_v53, %v580_v33  ;;  %v684_v56 = vpop.f32.mrb[6].mxu0 }
 0x249   : > { %v1294_v57 = vpop.eup %1293  ;;  %1313 = vtanh.f32 %v768_v51  ;;  %v685_v58 = vadd.f32 %v684_v56, %v585_v54  ;;  %v686_v59 = vpop.f32.mrb[7].mxu0 }
 0x24a   : > { %v1296_v60 = vpop.eup %1295  ;;  %1315 = vtanh.f32 %v770_v55  ;;  %v773_v36 = vpop.f32.mrb[6].mxu1  ;;  %v687_v37 = vadd.f32 %v686_v59, %v585_v54 }
 0x24b   : > { %v1298_v38 = vpop.eup %1297  ;;  %1317 = vtanh.f32 %v685_v58  ;;  %v774_v61 = vadd.f32 %v773_v36, %v585_v54  ;;  %v775_v41 = vpop.f32.mrb[7].mxu1 }
 0x24c   : > { %v1300_v52 = vpop.eup %1299  ;;  %1319 = vtanh.f32 %v687_v37  ;;  %v776_v62 = vadd.f32 %v775_v41, %v585_v54 }
 0x24d   : > { %v1302_v63 = vpop.eup %1301  ;;  %1321 = vtanh.f32 %v774_v61 }
 0x24e   : > { %v1304_v0 = vpop.eup %1303  ;;  %1323 = vtanh.f32 %v776_v62  ;;  %v1137_v1 = vpack.c.bf16 %v1302_v63, %v1294_v57 }
 0x24f   : > { %v1306_v2 = vpop.eup %1305  ;;  %v1135_v3 = vpack.c.bf16 %v1304_v0, %v1296_v60 }
 0x250   : > { %v1308_v4 = vpop.eup %1307  ;;  %v1145_v5 = vpack.c.bf16 %v1306_v2, %v1298_v38 }
 0x251   : > { %v1310_v45 = vpop.eup %1309  ;;  %1136 = vmatprep.subr.bf16.mxu0 %v1135_v3  ;;  %v1143_v46 = vpack.c.bf16 %v1308_v4, %v1300_v52 }
 0x252   : > { %v1312_v47 = vpop.eup %1311  ;;  %1138 = vmatpush1.bf16.msra.mxu0 %v1137_v1 }
 0x253   : > { %v1314_v48 = vpop.eup %1313  ;;  %1144 = vmatprep.subr.bf16.mxu1 %v1143_v46 }
 0x254   : > { %v1316_v6 = vpop.eup %1315  ;;  %1146 = vmatpush1.bf16.msra.mxu1 %v1145_v5 }
 0x255   : > { %v1318_v7 = vpop.eup %1317 }
 0x256   : > { %v1320_v8 = vpop.eup %1319  ;;  %v1141_v9 = vpack.c.bf16 %v1318_v7, %v1310_v45 }
 0x257   : > { %v1322_v11 = vpop.eup %1321  ;;  %v1139_v12 = vpack.c.bf16 %v1320_v8, %v1312_v47 }
 0x258   : > { %v1324_v13 = vpop.eup %1323  ;;  %v1149_v14 = vpack.c.bf16 %v1322_v11, %v1314_v48 }
 0x259   : > { %1140 = vmatprep.subr.bf16.mxu0 %v1139_v12  ;;  %v1147_v15 = vpack.c.bf16 %v1324_v13, %v1316_v6 }
 0x25a   : > { %1142 = vmatpush1.bf16.msra.mxu0 %v1141_v9 }
 0x25b   : > { %1148 = vmatprep.subr.bf16.mxu1 %v1147_v15 }
 0x25c   : > { %1150 = vmatpush1.bf16.msra.mxu1 %v1149_v14 }
 0x25d   : > { %1110 = vmatmul.mubr.msk.f32.vlgmr.msra.gmra.mrb[8].mxu0 %vm587_vm0, %v794_v16 }
 0x25f   : > { %1111 = vmatmul.mubr.msk.f32.vlgmr.msra.gmra.mrb[8].mxu1 %vm587_vm0, %v794_v16 }
 0x330   : > { %v864_v17 = vpop.f32.mrb[8].mxu0 }
 0x331   : > { %v866_v18 = vpop.f32.mrb[9].mxu0 }
 0x332   : > { %v935_v19 = vpop.f32.mrb[8].mxu1  ;;  %v944_v20 = vcombine.low %v864_v17, %v866_v18 }
 0x333   : > { %v937_v21 = vpop.f32.mrb[9].mxu1 }
 0x334   : > { %948 = vst [vmem:[%s338_s11] sm:$0xff] %v944_v20  ;;  %v945_v22 = vcombine.low %v935_v19, %v937_v21 }
 0x336   : > { %949 = vst [vmem:[%s338_s11 + $0x8] sm:$0xff] %v945_v22 }
 0x337   : > { %1508 = shalt.err (!%p1505_p3)
}
 0x338   : > { %s1509_s15 = scalar_lea.hbm %s1958_s8, 256  ;;  %s1513_s29 = scalar_lea.hbm %s2008_s6, 512 }
 0x339   : > { %p1510_p6 = scmp.ne.s32.totalorder %s1958_s8, %s1509_s15  ;;  %p1514_p8 = scmp.lt.u32.totalorder %s1958_s8, %s2008_s6 }
 0x33a   : > { %p1515_p5 = scmp.lt.u32.totalorder %s1513_s29, %s1509_s15  ;;  %p1517_p7 = scmp.lt.u32.totalorder %s1509_s15, %s1958_s8 }
 0x33b   : > { %p1511_p10 = pnand %p1510_p6, %p2027_p4 }
 0x33c   : > { %p1516_p9 = por %p1515_p5, %p1514_p8 }
 0x33d   : > { %p1512_p11 = pneg %p1511_p10 }
 0x33e   : > { %p1518_p12 = por %p1517_p7, %p1516_p9 }
 0x340   : > { %p1519_p1 = pnand %p1518_p12, %p1512_p11 }
 0x342   : > { %1522 = shalt.err (!%p1519_p1)
}
 0x343   : > { %1173 = dma.vmem_to_hbm [thread:$0]  (%p2027_p4), %s1960_s13, 256, %s1958_s8, %s951_s16  }
 0x344 PF: > { %s977_s11 = sand.u32 1, %s1561_s21   ;;  %p2028_p13 = scmp.ne.s32.totalorder %s2018_s26, 0 }
 0x345   : > { %p2029_p0 = scmp.ge.s32.totalorder %s1573_s24, 2  ;;  %s978_s19 = scalar_lea.sflag [#allocation4], %s977_s11 }
 0x347   : > { %p1196_p2 = pnand %p2029_p0, %p2028_p13 }
 0x349   : > { %1556 = dma.done.wait (!%p1196_p2), %s978_s19, 256  }
 0x34a   : > { %1558 = vsyncadd (!%p1196_p2), %s978_s19, 4294967040  ;;  %p22_p3 = scmp.ge.s32.totalorder %s1792_s7, 4   ;;  %s2030_s21 = smov %s1565_s22 }
 0x34b   : > { %s2031_s22 = smov %s1569_s23  ;;  %s2032_s23 = smov %s1804_s9 }
 0x34c   : > { %s2033_s24 = smov %s1792_s7  ;;  %24 = sbr.rel (!%p22_p3) target bundleno = 8 (0x8), region = 109 }
 0x353   :  { %983 = vsyncpa [#allocation3], 1 }
 0x354   :  { %985 = vsyncpa [#allocation3 + $0x1], 1 }
 0x355   :  { %986 = vsyncpa [#allocation6], 1 }
 0x356   :  { %987 = vsyncpa [#allocation9], 1 }
 0x357   :  { %988 = vsyncpa [#allocation12], 1 }
 0x358   :  { %989 = vsyncpa [#allocation4], 1 }
 0x359   :  { %991 = vsyncpa [#allocation4 + $0x1], 1 }

</bundles_post_ra>
